<compile_context>
chip_gen: v7x
topology: tpu7x:2x2x1
jax: 0.10.0
libtpu: 0.0.40
codegen_flags: <defaults>
</compile_context>

<pallas_src>
import jax
import jax.numpy as jnp
from jax.experimental import pallas as pl
from jax.experimental.pallas import tpu as pltpu


def _round_up(x, m):
    return (x + m - 1) // m * m


def _fusion_kernel(img_ref, txt_ref, w1a_ref, w1b_ref, b1_ref, w2_ref, b2_ref,
                   out_ref):
    # img/txt: [TB, D] bf16 tiles (BN already folded into the weights).
    # w1a/w1b: [D, H] bf16 halves of Linear(2D->H) with BN folded in.
    # b1: [1, H] f32 folded bias. w2: [H, Cp] bf16 (lane-padded). b2: [1, Cp] f32.
    # out: [TB, Cp] f32 lane-dense slab.

    # Linear(2D -> H) as a split matmul over the concat halves, f32 accumulation.
    h = jnp.dot(img_ref[...], w1a_ref[...], preferred_element_type=jnp.float32)
    h = h + jnp.dot(txt_ref[...], w1b_ref[...], preferred_element_type=jnp.float32)
    h = jnp.maximum(h + b1_ref[...], 0.0)          # bias + ReLU

    # Dropout: identity in eval mode.

    # Linear(H -> C) in bf16 (single MXU pass on all generations incl. v7x),
    # f32 accumulation, into the lane-padded output slab.
    out = jnp.dot(h.astype(jnp.bfloat16), w2_ref[...],
                  preferred_element_type=jnp.float32)
    out_ref[...] = (out + b2_ref[...]).astype(out_ref.dtype)


def prepare_params(params, eps=1e-5):
    """One-time parameter prep (NOT in the per-call hot path):
       fold BN(eval) fully into Linear1 (weights + bias), split + bf16-cast w1,
       bf16-cast + lane-pad w2, lane-pad b2."""
    F, H = params["w1"].shape
    D = F // 2
    C = params["w2"].shape[1]
    Cp = _round_up(max(C, 128), 128)

    inv_std = jax.lax.rsqrt(params["bn_var"] + eps)
    scale = params["bn_gamma"] * inv_std
    shift = params["bn_beta"] - params["bn_mean"] * scale

    # (x*scale + shift) @ w1 + b1  ==  x @ (scale[:,None]*w1) + (b1 + shift@w1)
    w1_folded = scale[:, None] * params["w1"]                  # [2D, H] f32
    b1_folded = params["b1"] + shift @ params["w1"]            # [H]    f32

    w2 = (jnp.zeros((H, Cp), jnp.float32).at[:, :C].set(params["w2"])
          .astype(jnp.bfloat16))
    b2 = jnp.zeros((1, Cp), jnp.float32).at[0, :C].set(params["b2"])

    return {
        "w1_img": w1_folded[:D].astype(jnp.bfloat16),   # bf16 halves: half the DMA
        "w1_txt": w1_folded[D:].astype(jnp.bfloat16),
        "b1": b1_folded.reshape(1, H).astype(jnp.float32),
        "w2": w2,                                       # bf16, lane-padded
        "b2": b2,                                       # f32, lane-padded
        "num_classes": C,        # python int (static)
    }


def clip_fusion_forward(image_feature, text_feature, prepared, *, block_b=512):
    """Runs the CLIPFusion head. image_feature/text_feature: [B, D] (bf16 preferred)."""
    B, D = image_feature.shape
    H = prepared["b1"].shape[1]
    Cp = prepared["w2"].shape[1]
    C = prepared["num_classes"]

    # Activations are streamed bf16 (CLIP embeddings should be stored bf16 in
    # HBM by the producer; the cast below is a no-op in that case).
    if image_feature.dtype != jnp.bfloat16:
        image_feature = image_feature.astype(jnp.bfloat16)
    if text_feature.dtype != jnp.bfloat16:
        text_feature = text_feature.astype(jnp.bfloat16)

    # Batch tile: as large as possible (DMA roofline, per-step overhead), sublane
    # aligned; keep >=2 grid steps when the batch allows so v7x megacore can
    # shard the "parallel" axis across both TensorCores.
    TB = min(block_b, _round_up(B, 8))
    if pl.cdiv(B, TB) < 2 and B > 8:
        TB = _round_up(pl.cdiv(B, 2), 8)
    grid = (pl.cdiv(B, TB),)   # ragged tail tile handled by Pallas masking (no jnp.pad)

    row = lambda i: (i, 0)      # tiles marching over batch
    rep = lambda i: (0, 0)      # weights stay VMEM-resident across steps

    flops = 2 * B * (2 * D) * H + 2 * B * H * Cp
    bytes_accessed = (2 * B * D * 2          # bf16 activations
                      + 2 * D * H * 2        # bf16 w1 halves
                      + H * Cp * 2           # bf16 w2
                      + (H + Cp) * 4         # f32 biases
                      + B * Cp * 4)          # f32 output slab

    out = pl.pallas_call(
        _fusion_kernel,
        out_shape=jax.ShapeDtypeStruct((B, Cp), jnp.float32),
        grid_spec=pl.GridSpec(
            grid=grid,
            in_specs=[
                pl.BlockSpec((TB, D), row),     # image features (bf16)
                pl.BlockSpec((TB, D), row),     # text features  (bf16)
                pl.BlockSpec((D, H), rep),      # w1 image half (BN-folded, bf16)
                pl.BlockSpec((D, H), rep),      # w1 text half  (BN-folded, bf16)
                pl.BlockSpec((1, H), rep),      # b1 (folded, f32)
                pl.BlockSpec((H, Cp), rep),     # w2 (bf16, lane-padded)
                pl.BlockSpec((1, Cp), rep),     # b2 (f32, lane-padded)
            ],
            out_specs=pl.BlockSpec((TB, Cp), row),
        ),
        compiler_params=pltpu.CompilerParams(
            dimension_semantics=("parallel",),   # batch tiles can split across cores
        ),
        cost_estimate=pl.CostEstimate(flops=flops, transcendentals=0,
                                      bytes_accessed=bytes_accessed),
    )(image_feature, text_feature,
      prepared["w1_img"], prepared["w1_txt"], prepared["b1"],
      prepared["w2"], prepared["b2"])

    return out[:, :C]


def init_params(key, output_dim=512, hidden=128, num_classes=2):
    F = 2 * output_dim
    ks = jax.random.split(key, 6)
    return {
        # BatchNorm1d(2*output_dim) running stats + affine (deterministic, non-trivial)
        "bn_gamma": 1.0 + 0.1 * jax.random.normal(ks[0], (F,), jnp.float32),
        "bn_beta": 0.1 * jax.random.normal(ks[1], (F,), jnp.float32),
        "bn_mean": 0.05 * jax.random.normal(ks[2], (F,), jnp.float32),
        "bn_var": jnp.abs(1.0 + 0.1 * jax.random.normal(ks[3], (F,), jnp.float32)),
        # Linear(2*output_dim, 128)
        "w1": (jax.random.normal(ks[4], (F, hidden), jnp.float32)
               / jnp.sqrt(jnp.float32(F))),
        "b1": jnp.zeros((hidden,), jnp.float32),
        # Linear(128, num_classes)
        "w2": (jax.random.normal(ks[5], (hidden, num_classes), jnp.float32)
               / jnp.sqrt(jnp.float32(hidden))),
        "b2": jnp.zeros((num_classes,), jnp.float32),
    }


def _reference_mixed(image_feature, text_feature, params):
    """Pure-JAX reference mirroring the kernel's mixed precision
       (bf16 activations, BN folded into bf16 w1, bf16 second matmul,
        f32 accumulation / biases)."""
    eps = 1e-5
    D = image_feature.shape[1]
    x_img = image_feature.astype(jnp.bfloat16)
    x_txt = text_feature.astype(jnp.bfloat16)

    inv_std = jax.lax.rsqrt(params["bn_var"] + eps)
    scale = params["bn_gamma"] * inv_std
    shift = params["bn_beta"] - params["bn_mean"] * scale
    w1f = scale[:, None] * params["w1"]
    b1f = params["b1"] + shift @ params["w1"]

    h = (jnp.dot(x_img, w1f[:D].astype(jnp.bfloat16),
                 preferred_element_type=jnp.float32)
         + jnp.dot(x_txt, w1f[D:].astype(jnp.bfloat16),
                   preferred_element_type=jnp.float32)
         + b1f)
    h = jnp.maximum(h, 0.0)
    return (jnp.dot(h.astype(jnp.bfloat16), params["w2"].astype(jnp.bfloat16),
                    preferred_element_type=jnp.float32) + params["b2"])


def _reference_f32(image_feature, text_feature, params):
    """Full-precision module semantics (eval mode)."""
    eps = 1e-5
    x = jnp.concatenate([image_feature.astype(jnp.float32),
                         text_feature.astype(jnp.float32)], axis=-1)
    xn = (x - params["bn_mean"]) / jnp.sqrt(params["bn_var"] + eps)
    xn = xn * params["bn_gamma"] + params["bn_beta"]
    h = jnp.maximum(xn @ params["w1"] + params["b1"], 0.0)
    return h @ params["w2"] + params["b2"]


if __name__ == "__main__":
    key = jax.random.PRNGKey(0)
    k_img, k_txt, k_par = jax.random.split(key, 3)

    B = 64             # two 32-row batch tiles -> grid of 2 "parallel" steps
    output_dim = 512   # CLIP projection dim (module default)
    num_classes = 2

    # Synthesized CLIP projection embeddings, stored bf16 (halves activation DMA).
    image_feature = jax.random.normal(
        k_img, (B, output_dim), jnp.float32).astype(jnp.bfloat16)
    text_feature = jax.random.normal(
        k_txt, (B, output_dim), jnp.float32).astype(jnp.bfloat16)

    raw_params = init_params(k_par, output_dim=output_dim, num_classes=num_classes)
    prepared = prepare_params(raw_params)   # one-time fold/layout prep, off hot path

    fwd = jax.jit(lambda img, txt: clip_fusion_forward(img, txt, prepared))
    out = jax.block_until_ready(fwd(image_feature, text_feature))

    assert out.shape == (B, num_classes)

    ref_mixed = _reference_mixed(image_feature, text_feature, raw_params)
    assert jnp.allclose(out, ref_mixed, atol=2e-3, rtol=2e-3), \
        float(jnp.max(jnp.abs(out - ref_mixed)))

    ref_f32 = _reference_f32(image_feature, text_feature, raw_params)
    assert jnp.allclose(out, ref_f32, atol=5e-2, rtol=5e-2), \
        float(jnp.max(jnp.abs(out - ref_f32)))

    print("KERNEL_OK")
</pallas_src>

<mosaic_0001>
module attributes {stable_mosaic.version = 11 : i64} {
  func.func @_fusion_kernel(%arg0: i32, %arg1: memref<32x512xbf16, #tpu.memory_space<vmem>>, %arg2: memref<32x512xbf16, #tpu.memory_space<vmem>>, %arg3: memref<512x128xbf16, #tpu.memory_space<vmem>>, %arg4: memref<512x128xbf16, #tpu.memory_space<vmem>>, %arg5: memref<1x128xf32, #tpu.memory_space<vmem>>, %arg6: memref<128x128xbf16, #tpu.memory_space<vmem>>, %arg7: memref<1x128xf32, #tpu.memory_space<vmem>>, %arg8: memref<32x128xf32, #tpu.memory_space<vmem>>) attributes {dimension_semantics = [#tpu.dimension_semantics<parallel>], iteration_bounds = array<i64: 2>, scalar_prefetch = 0 : i64, scratch_operands = 0 : i64, tpu.core_type = #tpu.core_type<tc>, window_params = [{transform_indices = @transform_0, window_bounds = array<i64: 32, 512>}, {transform_indices = @transform_1, window_bounds = array<i64: 32, 512>}, {pipeline_mode = #tpu.pipeline_mode<synchronous>, transform_indices = @transform_2, window_bounds = array<i64: 512, 128>}, {pipeline_mode = #tpu.pipeline_mode<synchronous>, transform_indices = @transform_3, window_bounds = array<i64: 512, 128>}, {pipeline_mode = #tpu.pipeline_mode<synchronous>, transform_indices = @transform_4, window_bounds = array<i64: 1, 128>}, {pipeline_mode = #tpu.pipeline_mode<synchronous>, transform_indices = @transform_5, window_bounds = array<i64: 128, 128>}, {pipeline_mode = #tpu.pipeline_mode<synchronous>, transform_indices = @transform_6, window_bounds = array<i64: 1, 128>}, {transform_indices = @transform_7, window_bounds = array<i64: 32, 128>}]} {
    %c0 = arith.constant 0 : index
    %c0_0 = arith.constant 0 : index
    %0 = vector.load %arg1[%c0, %c0_0] : memref<32x512xbf16, #tpu.memory_space<vmem>>, vector<32x512xbf16>
    %c0_1 = arith.constant 0 : index
    %c0_2 = arith.constant 0 : index
    %1 = vector.load %arg3[%c0_1, %c0_2] : memref<512x128xbf16, #tpu.memory_space<vmem>>, vector<512x128xbf16>
    %cst = arith.constant dense<0.000000e+00> : vector<32x128xf32>
    %2 = tpu.matmul %0, %1, %cst {dimension_numbers = #tpu.dot_dimension_numbers<[1], [0], [0], [1], [0, 0, 1, 1], [], []>} : vector<32x512xbf16>, vector<512x128xbf16>, vector<32x128xf32> -> vector<32x128xf32>
    %c0_3 = arith.constant 0 : index
    %c0_4 = arith.constant 0 : index
    %3 = vector.load %arg2[%c0_3, %c0_4] : memref<32x512xbf16, #tpu.memory_space<vmem>>, vector<32x512xbf16>
    %c0_5 = arith.constant 0 : index
    %c0_6 = arith.constant 0 : index
    %4 = vector.load %arg4[%c0_5, %c0_6] : memref<512x128xbf16, #tpu.memory_space<vmem>>, vector<512x128xbf16>
    %cst_7 = arith.constant dense<0.000000e+00> : vector<32x128xf32>
    %5 = tpu.matmul %3, %4, %cst_7 {dimension_numbers = #tpu.dot_dimension_numbers<[1], [0], [0], [1], [0, 0, 1, 1], [], []>} : vector<32x512xbf16>, vector<512x128xbf16>, vector<32x128xf32> -> vector<32x128xf32>
    %6 = arith.addf %2, %5 : vector<32x128xf32>
    %c0_8 = arith.constant 0 : index
    %c0_9 = arith.constant 0 : index
    %7 = vector.load %arg5[%c0_8, %c0_9] : memref<1x128xf32, #tpu.memory_space<vmem>>, vector<1x128xf32>
    %8 = vector.broadcast %7 : vector<1x128xf32> to vector<32x128xf32>
    %9 = arith.addf %6, %8 : vector<32x128xf32>
    %cst_10 = arith.constant 0.000000e+00 : f32
    %10 = vector.broadcast %cst_10 : f32 to vector<32x128xf32>
    %11 = arith.maximumf %9, %10 : vector<32x128xf32>
    %12 = arith.truncf %11 : vector<32x128xf32> to vector<32x128xbf16>
    %c0_11 = arith.constant 0 : index
    %c0_12 = arith.constant 0 : index
    %13 = vector.load %arg6[%c0_11, %c0_12] : memref<128x128xbf16, #tpu.memory_space<vmem>>, vector<128x128xbf16>
    %cst_13 = arith.constant dense<0.000000e+00> : vector<32x128xf32>
    %14 = tpu.matmul %12, %13, %cst_13 {dimension_numbers = #tpu.dot_dimension_numbers<[1], [0], [0], [1], [0, 0, 1, 1], [], []>} : vector<32x128xbf16>, vector<128x128xbf16>, vector<32x128xf32> -> vector<32x128xf32>
    %c0_14 = arith.constant 0 : index
    %c0_15 = arith.constant 0 : index
    %15 = vector.load %arg7[%c0_14, %c0_15] : memref<1x128xf32, #tpu.memory_space<vmem>>, vector<1x128xf32>
    %16 = vector.broadcast %15 : vector<1x128xf32> to vector<32x128xf32>
    %17 = arith.addf %14, %16 : vector<32x128xf32>
    %c0_16 = arith.constant 0 : index
    %c0_17 = arith.constant 0 : index
    %18 = vector.load %arg8[%c0_16, %c0_17] : memref<32x128xf32, #tpu.memory_space<vmem>>, vector<32x128xf32>
    tpu.vector_store %arg8[%c0_16, %c0_17], %17 {strides = array<i32>} : memref<32x128xf32, #tpu.memory_space<vmem>>, vector<32x128xf32>,
    return
  }
  func.func @transform_0(%arg0: i32) -> (i32, i32) {
    %c0_i32 = arith.constant 0 : i32
    %c0_i32_0 = arith.constant 0 : i32
    return %arg0, %c0_i32 : i32, i32
  }
  func.func @transform_1(%arg0: i32) -> (i32, i32) {
    %c0_i32 = arith.constant 0 : i32
    %c0_i32_0 = arith.constant 0 : i32
    return %arg0, %c0_i32 : i32, i32
  }
  func.func @transform_2(%arg0: i32) -> (i32, i32) {
    %c0_i32 = arith.constant 0 : i32
    %c0_i32_0 = arith.constant 0 : i32
    %c0_i32_1 = arith.constant 0 : i32
    return %c0_i32, %c0_i32_0 : i32, i32
  }
  func.func @transform_3(%arg0: i32) -> (i32, i32) {
    %c0_i32 = arith.constant 0 : i32
    %c0_i32_0 = arith.constant 0 : i32
    %c0_i32_1 = arith.constant 0 : i32
    return %c0_i32, %c0_i32_0 : i32, i32
  }
  func.func @transform_4(%arg0: i32) -> (i32, i32) {
    %c0_i32 = arith.constant 0 : i32
    %c0_i32_0 = arith.constant 0 : i32
    %c0_i32_1 = arith.constant 0 : i32
    return %c0_i32, %c0_i32_0 : i32, i32
  }
  func.func @transform_5(%arg0: i32) -> (i32, i32) {
    %c0_i32 = arith.constant 0 : i32
    %c0_i32_0 = arith.constant 0 : i32
    %c0_i32_1 = arith.constant 0 : i32
    return %c0_i32, %c0_i32_0 : i32, i32
  }
  func.func @transform_6(%arg0: i32) -> (i32, i32) {
    %c0_i32 = arith.constant 0 : i32
    %c0_i32_0 = arith.constant 0 : i32
    %c0_i32_1 = arith.constant 0 : i32
    return %c0_i32, %c0_i32_0 : i32, i32
  }
  func.func @transform_7(%arg0: i32) -> (i32, i32) {
    %c0_i32 = arith.constant 0 : i32
    %c0_i32_0 = arith.constant 0 : i32
    return %arg0, %c0_i32 : i32, i32
  }
}

</mosaic_0001>

<bundles_post_ra>
// kernel: _lambda_.1
= control target key start
LH: loop header
LB: loop body
LE: loop exit
PB: predicated region body
PF: predicated region fallthrough
CT: control target
= control target key end

     0   :  { %s2422_s0 = inlined_call_operand.hbm [shape: bf16[64,512], index: 0, kind: input, shape index: {}]   ;;  %s2423_s1 = inlined_call_operand.hbm [shape: bf16[64,512], index: 1, kind: input, shape index: {}]   ;;  %s2424_s2 = inlined_call_operand.hbm [shape: bf16[512,128], index: 2, kind: input, shape index: {}]   ;;  %s2425_s3 = inlined_call_operand.hbm [shape: bf16[512,128], index: 3, kind: input, shape index: {}]   ;;  %s2426_s4 = inlined_call_operand.vmem [shape: f32[1,128], index: 4, kind: input, shape index: {}]   ;;  %s2427_s5 = inlined_call_operand.hbm [shape: bf16[128,128], index: 5, kind: input, shape index: {}]   ;;  %s2428_s6 = inlined_call_operand.vmem [shape: f32[1,128], index: 6, kind: input, shape index: {}]   ;;  %s2429_s7 = inlined_call_operand.vmem [shape: f32[64,128], index: 7, kind: output, shape index: {}]  }
   0x1   :  { %2433 = sst [smem:[#allocation14_spill]] %s2422_s0 }
   0x2   :  { %12 = vsyncpa [#allocation3], 0 }
   0x3   :  { %14 = vsyncpa [#allocation3 + $0x1], 0 }
   0x4   :  { %15 = vsyncpa [#allocation5], 0 }
   0x5   :  { %17 = vsyncpa [#allocation5 + $0x1], 0 }
   0x6   :  { %18 = vsyncpa [#allocation8], 0  ;;  %s2128_s24 = smov 0   ;;  %s2130_s25 = smov 0  }
   0x7   :  { %s2132_s26 = smov 0   ;;  %s2134_s27 = smov 0  }
   0x8 LB: > { %s2147_s28 = sadd.s32 4294967295, %s2077_s27   ;;  %p44_p0 = scmp.ne.s32.totalorder %s2069_s25, %s2065_s24  ;;  %s2077_s27 = sphi %s2134_s27, %s2449_s27   ;;  %s2073_s26 = sphi %s2132_s26, %s2448_s26   ;;  %s2069_s25 = sphi %s2130_s25, %s2447_s25   ;;  %s2065_s24 = sphi %s2128_s24, %s2446_s24  }
   0x9   : > { %p2430_p1 = scmp.eq.s32.totalorder %s2147_s28, 0  ;;  %p1453_p2 = scmp.ge.s32.totalorder %s2077_s27, 1 }
   0xa   : > { %p212_p3 = scmp.lt.s32.totalorder %s2077_s27, 3  ;;  %s2079_s8 = smov [#allocation6]  }
   0xb   : > { %p2155_p4 = por %p2430_p1, %p44_p0  ;;  %s224_s9 = sshll.u32 %s2079_s8, 4  ;;  %s2163_s9 = int_to_ptr.vmem [resolvable:$true] %s224_s9 }
   0xc   : > { %p2159_p5 = pnand %p1453_p2, %p212_p3  ;;  %s2080_s11 = smov [#allocation7]  }
   0xd   : > { %s2434_s29 = scalar_select %p2155_p4, 1, 0 }
   0xe   : > { %s2435_s30 = scalar_select %p2159_p5, 1, 0 }
   0xf   : > { %p1728_p6 = pneg %p2159_p5  ;;  %s237_s12 = sshll.u32 %s2080_s11, 4  ;;  %s2173_s12 = int_to_ptr.vmem [resolvable:$true] %s237_s12 }
  0x10   : > { %s2081_s13 = smov [#allocation9]   ;;  %s1887_s17 = scalar_lea.hbm %s2424_s2, 4096 }
  0x11   : > { %p2169_p7 = pnand %p1728_p6, %p2430_p1  ;;  %s2175_s14 = sshll.u32 %s2081_s13, 4  ;;  %s254_s14 = int_to_ptr.vmem [resolvable:$true] %s2175_s14 }
  0x12   : > { %p1888_p8 = scmp.ne.s32.totalorder %s2424_s2, %s1887_s17  ;;  %p1894_p12 = scmp.lt.u32.totalorder %s1887_s17, %s2424_s2 }
  0x13   : > { %p2185_p9 = pneg %p2169_p7 }
  0x15   : > { %p1890_p10 = pnand %p2185_p9, %p1888_p8 }
  0x17   : > { %p1891_p11 = pneg %p1890_p10 }
  0x19   : > { %p1896_p13 = pnand %p1894_p12, %p1891_p11 }
  0x1b   : > { %1899 = shalt.err (!%p1896_p13)
}
  0x1c   : > { %s1900_s23 = scalar_lea.vmem %s2163_s9, 4096  ;;  %p1908_p6 = scmp.lt.s32.totalorder %s2163_s9, %s2163_s9 }
  0x1d   : > { %p1901_p0 = scmp.ne.s32.totalorder %s2163_s9, %s1900_s23  ;;  %p1909_p1 = scmp.lt.s32.totalorder %s1900_s23, %s1900_s23 }
  0x1f   : > { %p1903_p2 = pnand %p1901_p0, %p2185_p9  ;;  %p1910_p8 = por %p1909_p1, %p1908_p6 }
  0x21   : > { %p1904_p3 = pneg %p1903_p2 }
  0x23   : > { %p1911_p10 = pnand %p1910_p8, %p1904_p3 }
  0x25   : > { %1914 = shalt.err (!%p1911_p10)
}
  0x26   : > { %s2082_s24 = smov 64   ;;  %s2083_s8 = smov 4  }
  0x27   : > { %1731 = dma.hbm_to_vmem [thread:$0]  (!%p2169_p7), %s2424_s2, 4096, %s2163_s9, [#allocation5], %s2082_s24, %s2082_s24, %s2083_s8  }
  0x28   : > { %s1915_s17 = scalar_lea.hbm %s2425_s3, 4096 }
  0x29   : > { %p1916_p1 = scmp.ne.s32.totalorder %s2425_s3, %s1915_s17  ;;  %p1922_p13 = scmp.lt.u32.totalorder %s1915_s17, %s2425_s3 }
  0x2b   : > { %p1918_p11 = pnand %p1916_p1, %p2185_p9 }
  0x2d   : > { %p1919_p12 = pneg %p1918_p11 }
  0x2f   : > { %p1924_p0 = pnand %p1922_p13, %p1919_p12 }
  0x31   : > { %1927 = shalt.err (!%p1924_p0)
}
  0x32   : > { %s1928_s9 = scalar_lea.vmem %s2173_s12, 4096  ;;  %p1936_p8 = scmp.lt.s32.totalorder %s2173_s12, %s2173_s12 }
  0x33   : > { %p1929_p2 = scmp.ne.s32.totalorder %s2173_s12, %s1928_s9  ;;  %p1937_p10 = scmp.lt.s32.totalorder %s1928_s9, %s1928_s9 }
  0x35   : > { %p1931_p3 = pnand %p1929_p2, %p2185_p9  ;;  %p1938_p1 = por %p1937_p10, %p1936_p8 }
  0x37   : > { %p1932_p6 = pneg %p1931_p3 }
  0x39   : > { %p1939_p11 = pnand %p1938_p1, %p1932_p6 }
  0x3b   : > { %1942 = shalt.err (!%p1939_p11)
}
  0x3c   : > { %1734 = dma.hbm_to_vmem [thread:$0]  (!%p2169_p7), %s2425_s3, 4096, %s2173_s12, [#allocation8], %s2082_s24, %s2082_s24, %s2083_s8  }
  0x3d   : > { %s1943_s16 = scalar_lea.hbm %s2427_s5, 1024 }
  0x3e   : > { %p1944_p12 = scmp.ne.s32.totalorder %s2427_s5, %s1943_s16  ;;  %p1950_p2 = scmp.lt.u32.totalorder %s1943_s16, %s2427_s5 }
  0x40   : > { %p1946_p13 = pnand %p1944_p12, %p2185_p9 }
  0x42   : > { %p1947_p0 = pneg %p1946_p13 }
  0x44   : > { %p1952_p3 = pnand %p1950_p2, %p1947_p0 }
  0x46   : > { %1955 = shalt.err (!%p1952_p3)
}
  0x47   : > { %s1956_s22 = scalar_lea.vmem %s254_s14, 1024  ;;  %p1964_p1 = scmp.lt.s32.totalorder %s254_s14, %s254_s14 }
  0x48   : > { %p1957_p6 = scmp.ne.s32.totalorder %s254_s14, %s1956_s22  ;;  %p1965_p11 = scmp.lt.s32.totalorder %s1956_s22, %s1956_s22 }
  0x4a   : > { %p1959_p8 = pnand %p1957_p6, %p2185_p9  ;;  %p1966_p4 = por %p1965_p11, %p1964_p1 }
  0x4c   : > { %p1960_p10 = pneg %p1959_p8 }
  0x4e   : > { %p1967_p5 = pnand %p1966_p4, %p1960_p10 }
  0x50   : > { %1970 = shalt.err (!%p1967_p5)
}
  0x51   : > { %1737 = dma.hbm_to_vmem [thread:$0]  (!%p2169_p7), %s2427_s5, 1024, %s254_s14, [#allocation8], %s2082_s24, %s2082_s24, %s2083_s8  }
  0x52   : > { %s2258_s20 = sadd.s32 1, %s2077_s27   ;;  %s31_s23 = sadd.s32 1, %s2073_s26 }
  0x53   : > { %s28_s10 = ssub.s32 %s2077_s27, %s2258_s20  ;;  %p38_p5 = scmp.ne.s32.totalorder %s2073_s26, %s2069_s25 }
  0x54   : > { %p29_p4 = scmp.eq.s32.totalorder %s28_s10, 0  ;;  %p39_p9 = scmp.eq.s32.totalorder %s2077_s27, 0 }
  0x55   : > { %p1748_p12 = scmp.lt.s32.totalorder %s2077_s27, 2  ;;  %s270_s13 = sand.u32 1, %s2073_s26  }
  0x56   : > { %s2268_s11 = scalar_select %p29_p4, %s2073_s26, %s31_s23  }
  0x57   : > { %p40_p13 = por %p39_p9, %p38_p5  ;;  %s2271_s15 = sshll.u32 %s270_s13, 6 }
  0x58   : > { %s1567_s16 = sshll.u32 %s2077_s27, 10  ;;  %s2438_s0 = sld [smem:[#allocation14_spill]] }
  0x59   : > { %s274_s8 = scalar_lea.vmem [#allocation2], %s2271_s15  ;;  %p2284_p7 = pnand %p1748_p12, %p40_p13 }
  0x5a   : > { %s282_s18 = sshll.u32 %s274_s8, 4  ;;  %s2288_s21 = scalar_lea.sflag [#allocation3], %s270_s13  ;;  %s2282_s18 = int_to_ptr.vmem [resolvable:$true] %s282_s18 }
  0x5b   : > { %p1973_p2 = pneg %p2284_p7 }
  0x5e   : > { %s2279_s24 = scalar_lea.hbm %s2438_s0, %s1567_s16  ;;  %s1976_s10 = scalar_lea.hbm %s2438_s0, 2048 }
  0x5f   : > { %s1971_s22 = scalar_lea.hbm %s2279_s24, 1024  ;;  %p1977_p8 = scmp.lt.u32.totalorder %s2279_s24, %s2438_s0 }
  0x60   : > { %p1972_p0 = scmp.ne.s32.totalorder %s2279_s24, %s1971_s22  ;;  %p1978_p10 = scmp.lt.u32.totalorder %s1976_s10, %s1971_s22 }
  0x61   : > { %p1980_p11 = scmp.lt.u32.totalorder %s1971_s22, %s2279_s24 }
  0x62   : > { %p1974_p3 = pnand %p1973_p2, %p1972_p0  ;;  %p1979_p1 = por %p1978_p10, %p1977_p8 }
  0x64   : > { %p1975_p6 = pneg %p1974_p3  ;;  %p1981_p4 = por %p1980_p11, %p1979_p1 }
  0x66   : > { %p1982_p5 = pnand %p1981_p4, %p1975_p6 }
  0x68   : > { %1985 = shalt.err (!%p1982_p5)
}
  0x69   : > { %s1986_s13 = scalar_lea.vmem %s2282_s18, 1024  ;;  %s2084_s14 = smov [#allocation2]  }
  0x6a   : > { %p1987_p9 = scmp.ne.s32.totalorder %s2282_s18, %s1986_s13  ;;  %s1991_s8 = sshll.u32 %s2084_s14, 4  ;;  %s1992_s8 = int_to_ptr.vmem [resolvable:$false] %s1991_s8 }
  0x6b   : > { %s1993_s12 = scalar_lea.vmem %s1992_s8, 2048  ;;  %p1994_p0 = scmp.lt.s32.totalorder %s2282_s18, %s1992_s8 }
  0x6c   : > { %p1989_p12 = pnand %p1987_p9, %p1973_p2  ;;  %p1995_p3 = scmp.lt.s32.totalorder %s1993_s12, %s1986_s13 }
  0x6e   : > { %p1990_p13 = pneg %p1989_p12  ;;  %p1996_p8 = por %p1995_p3, %p1994_p0 }
  0x70   : > { %p1997_p10 = pnand %p1996_p8, %p1990_p13 }
  0x72   : > { %2000 = shalt.err (!%p1997_p10)
}
  0x73   : > { %s2085_s22 = smov 256   ;;  %s2086_s9 = smov 16  }
  0x74   : > { %1741 = dma.hbm_to_vmem [thread:$0]  (!%p2284_p7), %s2279_s24, 1024, %s2282_s18, %s2288_s21, %s2085_s22, %s2085_s22, %s2086_s9  }
  0x75   : > { %s2324_s17 = scalar_lea.hbm %s2423_s1, %s1567_s16  ;;  %s296_s13 = scalar_lea.vmem [#allocation4], %s2271_s15 }
  0x76   : > { %s304_s14 = sshll.u32 %s296_s13, 4  ;;  %s292_s8 = sand.u32 1, %s2077_s27   ;;  %s2327_s14 = int_to_ptr.vmem [resolvable:$true] %s304_s14 }
  0x77   : > { %s2330_s12 = scalar_lea.sflag [#allocation5], %s292_s8  ;;  %s2001_s0 = scalar_lea.hbm %s2324_s17, 1024 }
  0x78   : > { %p2002_p6 = scmp.ne.s32.totalorder %s2324_s17, %s2001_s0  ;;  %s2006_s18 = scalar_lea.hbm %s2423_s1, 2048 }
  0x79   : > { %p2007_p4 = scmp.lt.u32.totalorder %s2324_s17, %s2423_s1  ;;  %p2008_p5 = scmp.lt.u32.totalorder %s2006_s18, %s2001_s0 }
  0x7a   : > { %p2004_p1 = pnand %p2002_p6, %p1973_p2  ;;  %p2010_p12 = scmp.lt.u32.totalorder %s2001_s0, %s2324_s17 }
  0x7b   : > { %p2009_p9 = por %p2008_p5, %p2007_p4 }
  0x7c   : > { %p2005_p11 = pneg %p2004_p1 }
  0x7d   : > { %p2011_p13 = por %p2010_p12, %p2009_p9 }
  0x7f   : > { %p2012_p0 = pnand %p2011_p13, %p2005_p11 }
  0x81   : > { %2015 = shalt.err (!%p2012_p0)
}
  0x82   : > { %s2016_s27 = scalar_lea.vmem %s2327_s14, 1024  ;;  %s2087_s15 = smov [#allocation4]  }
  0x83   : > { %p2017_p3 = scmp.ne.s32.totalorder %s2327_s14, %s2016_s27  ;;  %s2021_s23 = sshll.u32 %s2087_s15, 4  ;;  %s2022_s23 = int_to_ptr.vmem [resolvable:$false] %s2021_s23 }
  0x84   : > { %s2023_s13 = scalar_lea.vmem %s2022_s23, 2048  ;;  %p2024_p6 = scmp.lt.s32.totalorder %s2327_s14, %s2022_s23 }
  0x85   : > { %p2019_p8 = pnand %p2017_p3, %p1973_p2  ;;  %p2025_p1 = scmp.lt.s32.totalorder %s2023_s13, %s2016_s27 }
  0x87   : > { %p2020_p10 = pneg %p2019_p8  ;;  %p2026_p4 = por %p2025_p1, %p2024_p6 }
  0x89   : > { %p2027_p5 = pnand %p2026_p4, %p2020_p10 }
  0x8b   : > { %2030 = shalt.err (!%p2027_p5)
}
  0x8c   : > { %1744 = dma.hbm_to_vmem [thread:$0]  (!%p2284_p7), %s2324_s17, 1024, %s2327_s14, %s2330_s12, %s2085_s22, %s2085_s22, %s2086_s9  }
  0x8d   : > { %p2440_p2 = scmp.ne.s32.totalorder %s2435_s30, 0 }
  0x8e   : > { %s318_s0 = sand.u32 (!%p2440_p2), 1, %s2069_s25   ;;  %p2441_p11 = scmp.ne.s32.totalorder (!%p2440_p2), %s2434_s29, 0 }
  0x8f   : > { %316 = sbr.rel (%p2440_p2) target bundleno = 679 (0x2a7), region = 48  ;;  %s1467_s8 = sshll.u32 (!%p2440_p2), %s318_s0, 6 }
  0x90   : > { %s319_s24 = scalar_lea.sflag (!%p2440_p2), [#allocation3], %s318_s0  ;;  %s2362_s16 = scalar_lea.vmem (!%p2440_p2), [#allocation2], %s1467_s8 }
  0x96   : > { %2048 = dma.done.wait (%p2441_p11), %s319_s24, 1024  }
  0x97   : > { %2050 = vsyncadd (%p2441_p11), %s319_s24, 4294966272  ;;  %s327_s19 = sand.u32 1, %s2147_s28   ;;  %s2369_s22 = scalar_lea.vmem [#allocation4], %s1467_s8 }
  0x98   : > { %s328_s18 = scalar_lea.sflag [#allocation5], %s327_s19 }
  0x99   : > { %2052 = dma.done.wait (%p2441_p11), %s328_s18, 1024  }
  0x9a   : > { %2054 = vsyncadd (%p2441_p11), %s328_s18, 4294966272  ;;  %p2442_p7 = scmp.eq.s32.totalorder %s2147_s28, 0 }
  0x9c   : > { %2056 = dma.done.wait (%p2442_p7), [#allocation5], 4096   ;;  %p2443_p9 = pmov %p2442_p7 }
  0x9d   : > { %p2444_p12 = pmov %p2442_p7 }
  0x9e   : > { %2058 = vsyncadd (%p2443_p9), [#allocation5], 4294963200 }
  0x9f   : > { %2060 = dma.done.wait (%p2444_p12), [#allocation8], 5120   ;;  %p2445_p13 = pmov %p2442_p7 }
  0xa0   : > { %v1791_v0 = vld [vmem:[#allocation7 + $0x40] sm:$0xff]   ;;  %v1795_v4 = vld [vmem:[#allocation7 + $0x48] sm:$0xff]   ;;  %v1799_v8 = vld [vmem:[#allocation7 + $0x50] sm:$0xff]   ;;  %s1472_s9 = sshll.u32 %s2147_s28, 2 }
  0xa1   : > { %2062 = vsyncadd (%p2445_p13), [#allocation8], 4294962176  ;;  %v1792_v1 = vld [vmem:[#allocation7 + $0xc0] sm:$0xff]   ;;  %1570 = vmatprep.subr.bf16.mxu0 %v1791_v0  ;;  %v1796_v5 = vld [vmem:[#allocation7 + $0xc8] sm:$0xff]   ;;  %p382_p0 = scmp.lt.s32.totalorder %s1472_s9, 7 }
  0xa2   : > { %v1793_v2 = vld [vmem:[#allocation7] sm:$0xff]   ;;  %1598 = vmatprep.subr.bf16.mxu1 %v1792_v1  ;;  %v1797_v6 = vld [vmem:[#allocation7 + $0x8] sm:$0xff]   ;;  %v1800_v9 = vld [vmem:[#allocation7 + $0xd0] sm:$0xff]  }
  0xa3   : > { %v1794_v3 = vld [vmem:[#allocation7 + $0x80] sm:$0xff]   ;;  %1571 = vmatpush3.bf16.msra.mxu0 %v1793_v2  ;;  %v1798_v7 = vld [vmem:[#allocation7 + $0x88] sm:$0xff]   ;;  %v1801_v10 = vld [vmem:[#allocation7 + $0x10] sm:$0xff]   ;;  %s2451_s9 = smov (!%p382_p0, %s1472_s9), 7 }
  0xa4   : > { %1599 = vmatpush3.bf16.msra.mxu1 %v1794_v3  ;;  %1572 = vmatprep.subr.bf16.mxu0 %v1795_v4  ;;  %v1802_v11 = vld [vmem:[#allocation7 + $0x90] sm:$0xff]   ;;  %v1803_v12 = vld [vmem:[#allocation7 + $0x58] sm:$0xff]   ;;  %v1807_v16 = vld [vmem:[#allocation7 + $0x60] sm:$0xff]   ;;  %s1473_s17 = sshll.u32 %s2451_s9, 3 }
  0xa5   : > { %1600 = vmatprep.subr.bf16.mxu1 %v1796_v5  ;;  %v1804_v13 = vld [vmem:[#allocation7 + $0xd8] sm:$0xff]   ;;  %v1808_v17 = vld [vmem:[#allocation7 + $0xe0] sm:$0xff]   ;;  %v1811_v20 = vld [vmem:[#allocation7 + $0x68] sm:$0xff]   ;;  %s385_s27 = scalar_lea.vmem %s2429_s7, %s1473_s17 }
  0xa6   : > { %v1805_v14 = vld [vmem:[#allocation7 + $0x18] sm:$0xff]   ;;  %v1809_v18 = vld [vmem:[#allocation7 + $0x20] sm:$0xff]   ;;  %v1812_v21 = vld [vmem:[#allocation7 + $0xe8] sm:$0xff]  }
  0xa7   : > { %1573 = vmatpush3.bf16.msra.mxu0 %v1797_v6  ;;  %v1806_v15 = vld [vmem:[#allocation7 + $0x98] sm:$0xff]   ;;  %v1810_v19 = vld [vmem:[#allocation7 + $0xa0] sm:$0xff]   ;;  %v1813_v22 = vld [vmem:[#allocation7 + $0x28] sm:$0xff]  }
  0xa8   : > { %1601 = vmatpush3.bf16.msra.mxu1 %v1798_v7  ;;  %1574 = vmatprep.subr.bf16.mxu0 %v1799_v8  ;;  %v1814_v23 = vld [vmem:[#allocation7 + $0xa8] sm:$0xff]   ;;  %v1815_v24 = vld [vmem:[#allocation7 + $0x70] sm:$0xff]   ;;  %v1819_v28 = vld [vmem:[#allocation7 + $0x78] sm:$0xff]  }
  0xa9   : > { %1602 = vmatprep.subr.bf16.mxu1 %v1800_v9  ;;  %v1816_v25 = vld [vmem:[#allocation7 + $0xf0] sm:$0xff]   ;;  %v1820_v29 = vld [vmem:[#allocation7 + $0xf8] sm:$0xff]   ;;  %v1829_v36 = vld [vmem:[#allocation6 + $0x40] sm:$0xff]  }
  0xaa   : > { %v1817_v26 = vld [vmem:[#allocation7 + $0x30] sm:$0xff]   ;;  %v1821_v30 = vld [vmem:[#allocation7 + $0x38] sm:$0xff]   ;;  %v1830_v37 = vld [vmem:[#allocation6 + $0xc0] sm:$0xff]  }
  0xab   : > { %1575 = vmatpush3.bf16.msra.mxu0 %v1801_v10  ;;  %v1818_v27 = vld [vmem:[#allocation7 + $0xb0] sm:$0xff]   ;;  %v1822_v31 = vld [vmem:[#allocation7 + $0xb8] sm:$0xff]   ;;  %v1831_v38 = vld [vmem:[#allocation6] sm:$0xff]  }
  0xac   : > { %1603 = vmatpush3.bf16.msra.mxu1 %v1802_v11  ;;  %1576 = vmatprep.subr.bf16.mxu0 %v1803_v12  ;;  %v1823_v32 = vld [vmem:[%s2369_s22] ss:$16 sps:$4 sm:$0xff]   ;;  %v1825_v33 = vld [vmem:[%s2369_s22 + $0x4] ss:$16 sps:$4 sm:$0xff]   ;;  %v1826_v34 = vld [vmem:[%s2369_s22 + $0x8] ss:$16 sps:$4 sm:$0xff]  }
  0xad   : > { %1604 = vmatprep.subr.bf16.mxu1 %v1804_v13  ;;  %v1828_v35 = vld [vmem:[%s2369_s22 + $0xc] ss:$16 sps:$4 sm:$0xff]   ;;  %796 = vmatprep.mubr.bf16.mxu0 %v1825_v33  ;;  %v1832_v39 = vld [vmem:[#allocation6 + $0x80] sm:$0xff]   ;;  %v1837_v44 = vld [vmem:[#allocation6 + $0x50] sm:$0xff]  }
  0xae   : > { %845 = vmatprep.mubr.bf16.mxu1 %v1828_v35  ;;  %v1833_v40 = vld [vmem:[#allocation6 + $0x48] sm:$0xff]   ;;  %v1838_v45 = vld [vmem:[#allocation6 + $0xd0] sm:$0xff]   ;;  %v1841_v48 = vld [vmem:[#allocation6 + $0x58] sm:$0xff]  }
  0xaf   : > { %1577 = vmatpush3.bf16.msra.mxu0 %v1805_v14  ;;  %v1834_v41 = vld [vmem:[#allocation6 + $0xc8] sm:$0xff]   ;;  %v1839_v46 = vld [vmem:[#allocation6 + $0x10] sm:$0xff]   ;;  %v1842_v49 = vld [vmem:[#allocation6 + $0xd8] sm:$0xff]  }
  0xb0   : > { %1605 = vmatpush3.bf16.msra.mxu1 %v1806_v15  ;;  %1578 = vmatprep.subr.bf16.mxu0 %v1807_v16  ;;  %v1835_v42 = vld [vmem:[#allocation6 + $0x8] sm:$0xff]   ;;  %v1840_v47 = vld [vmem:[#allocation6 + $0x90] sm:$0xff]   ;;  %v1843_v50 = vld [vmem:[#allocation6 + $0x18] sm:$0xff]  }
  0xb1   : > { %1606 = vmatprep.subr.bf16.mxu1 %v1808_v17  ;;  %v1836_v43 = vld [vmem:[#allocation6 + $0x88] sm:$0xff]   ;;  %v1844_v51 = vld [vmem:[#allocation6 + $0x98] sm:$0xff]   ;;  %v1845_v52 = vld [vmem:[#allocation6 + $0x60] sm:$0xff]  }
  0xb2   : > { %v1846_v53 = vld [vmem:[#allocation6 + $0xe0] sm:$0xff]   ;;  %v1851_v57 = vld [vmem:[%s2369_s22 + $0x2c] ss:$16 sps:$4 sm:$0xff]   ;;  %v1856_v61 = vld [vmem:[%s2369_s22 + $0x28] ss:$16 sps:$4 sm:$0xff]  }
  0xb3   : > { %1579 = vmatpush3.bf16.msra.mxu0 %v1809_v18  ;;  %v1847_v54 = vld [vmem:[#allocation6 + $0x20] sm:$0xff]   ;;  %v1853_v58 = vld [vmem:[#allocation6 + $0x68] sm:$0xff]   ;;  %v1859_v0 = vld [vmem:[#allocation6 + $0x70] sm:$0xff]  }
  0xb4   : > { %1607 = vmatpush3.bf16.msra.mxu1 %v1810_v19  ;;  %1580 = vmatprep.subr.bf16.mxu0 %v1811_v20  ;;  %v1848_v55 = vld [vmem:[#allocation6 + $0xa0] sm:$0xff]   ;;  %v1854_v59 = vld [vmem:[#allocation6 + $0xe8] sm:$0xff]   ;;  %v1860_v1 = vld [vmem:[#allocation6 + $0xf0] sm:$0xff]  }
  0xb5   : > { %1608 = vmatprep.subr.bf16.mxu1 %v1812_v21  ;;  %v1849_v56 = vld [vmem:[%s2369_s22 + $0x24] ss:$16 sps:$4 sm:$0xff]   ;;  %v1855_v60 = vld [vmem:[%s2369_s22 + $0x20] ss:$16 sps:$4 sm:$0xff]   ;;  %v1857_v62 = vld [vmem:[#allocation6 + $0x28] sm:$0xff]  }
  0xb6   : > { %v1858_v63 = vld [vmem:[#allocation6 + $0xa8] sm:$0xff]   ;;  %v1861_v2 = vld [vmem:[#allocation6 + $0x30] sm:$0xff]   ;;  %v1863_v4 = vld [vmem:[#allocation6 + $0x78] sm:$0xff]  }
  0xb7   : > { %1581 = vmatpush3.bf16.msra.mxu0 %v1813_v22  ;;  %v1862_v3 = vld [vmem:[#allocation6 + $0xb0] sm:$0xff]   ;;  %v1864_v5 = vld [vmem:[#allocation6 + $0xf8] sm:$0xff]   ;;  %v1879_v16 = vld [vmem:[#allocation9] sm:$0xff]  }
  0xb8   : > { %1609 = vmatpush3.bf16.msra.mxu1 %v1814_v23  ;;  %1582 = vmatprep.subr.bf16.mxu0 %v1815_v24  ;;  %v1865_v6 = vld [vmem:[#allocation6 + $0x38] sm:$0xff]   ;;  %v1867_v8 = vld [vmem:[%s2362_s16] ss:$16 sps:$4 sm:$0xff]   ;;  %v1869_v9 = vld [vmem:[%s2362_s16 + $0x4] ss:$16 sps:$4 sm:$0xff]  }
  0xb9   : > { %1610 = vmatprep.subr.bf16.mxu1 %v1816_v25  ;;  %v1866_v7 = vld [vmem:[#allocation6 + $0xb8] sm:$0xff]   ;;  %v1873_v12 = vld [vmem:[%s2362_s16 + $0x24] ss:$16 sps:$4 sm:$0xff]   ;;  %v1877_v14 = vld [vmem:[%s2362_s16 + $0x20] ss:$16 sps:$4 sm:$0xff]  }
  0xba   : > { %v1870_v10 = vld [vmem:[%s2362_s16 + $0x8] ss:$16 sps:$4 sm:$0xff]   ;;  %v1872_v11 = vld [vmem:[%s2362_s16 + $0xc] ss:$16 sps:$4 sm:$0xff]   ;;  %v1881_v18 = vld [vmem:[#allocation9 + $0x10] sm:$0xff]  }
  0xbb   : > { %1583 = vmatpush3.bf16.msra.mxu0 %v1817_v26  ;;  %v1875_v13 = vld [vmem:[%s2362_s16 + $0x2c] ss:$16 sps:$4 sm:$0xff]   ;;  %v1878_v15 = vld [vmem:[%s2362_s16 + $0x28] ss:$16 sps:$4 sm:$0xff]   ;;  %v1883_v20 = vld [vmem:[#allocation9 + $0x20] sm:$0xff]  }
  0xbc   : > { %1611 = vmatpush3.bf16.msra.mxu1 %v1818_v27  ;;  %1584 = vmatprep.subr.bf16.mxu0 %v1819_v28  ;;  %v1880_v17 = vld [vmem:[#allocation9 + $0x8] sm:$0xff]   ;;  %v1882_v19 = vld [vmem:[#allocation9 + $0x18] sm:$0xff]   ;;  %v1885_v22 = vld [vmem:[#allocation9 + $0x30] sm:$0xff]  }
  0xbd   : > { %1612 = vmatprep.subr.bf16.mxu1 %v1820_v29  ;;  %v1884_v21 = vld [vmem:[#allocation9 + $0x28] sm:$0xff]   ;;  %v1886_v23 = vld [vmem:[#allocation9 + $0x38] sm:$0xff]  }
  0xbf   : > { %1585 = vmatpush3.bf16.msra.mxu0 %v1821_v30 }
  0xc0   : > { %1613 = vmatpush3.bf16.msra.mxu1 %v1822_v31  ;;  %1626 = vmatprep.subr.bf16.mxu0 %v1829_v36 }
  0xc1   : > { %1654 = vmatprep.subr.bf16.mxu1 %v1830_v37 }
  0xc2   : > { %797 = vmatmul.mubr.bf16.vlgmr.msra.gmra.mrb[0].mxu0 %v1823_v32 }
  0xc3   : > { %846 = vmatmul.mubr.bf16.vlgmr.msra.gmra.mrb[0].mxu1 %v1826_v34  ;;  %1627 = vmatpush3.bf16.msra.mxu0 %v1831_v38 }
  0xc4   : > { %1655 = vmatpush3.bf16.msra.mxu1 %v1832_v39  ;;  %1628 = vmatprep.subr.bf16.mxu0 %v1833_v40 }
  0xc5   : > { %1656 = vmatprep.subr.bf16.mxu1 %v1834_v41  ;;  %804 = vmatprep.mubr.bf16.mxu0 %v1849_v56 }
  0xc6   : > { %853 = vmatprep.mubr.bf16.mxu1 %v1851_v57 }
  0xc7   : > { %1629 = vmatpush3.bf16.msra.mxu0 %v1835_v42 }
  0xc8   : > { %1657 = vmatpush3.bf16.msra.mxu1 %v1836_v43  ;;  %1630 = vmatprep.subr.bf16.mxu0 %v1837_v44 }
  0xc9   : > { %1658 = vmatprep.subr.bf16.mxu1 %v1838_v45 }
  0xca   : > { %805 = vmatmul.mubr.bf16.gmra.mrb[4].mxu0 %v1855_v60 }
  0xcb   : > { %1631 = vmatpush3.bf16.msra.mxu0 %v1839_v46  ;;  %854 = vmatmul.mubr.bf16.gmra.mrb[4].mxu1 %v1856_v61 }
  0xcc   : > { %1659 = vmatpush3.bf16.msra.mxu1 %v1840_v47  ;;  %1632 = vmatprep.subr.bf16.mxu0 %v1841_v48 }
  0xcd   : > { %1660 = vmatprep.subr.bf16.mxu1 %v1842_v49  ;;  %1126 = vmatprep.mubr.bf16.mxu0 %v1869_v9 }
  0xce   : > { %1175 = vmatprep.mubr.bf16.mxu1 %v1872_v11 }
  0xcf   : > { %1633 = vmatpush3.bf16.msra.mxu0 %v1843_v50 }
  0xd0   : > { %1661 = vmatpush3.bf16.msra.mxu1 %v1844_v51  ;;  %1634 = vmatprep.subr.bf16.mxu0 %v1845_v52 }
  0xd1   : > { %1662 = vmatprep.subr.bf16.mxu1 %v1846_v53 }
  0xd3   : > { %1635 = vmatpush3.bf16.msra.mxu0 %v1847_v54 }
  0xd4   : > { %1663 = vmatpush3.bf16.msra.mxu1 %v1848_v55  ;;  %1636 = vmatprep.subr.bf16.mxu0 %v1853_v58 }
  0xd5   : > { %1664 = vmatprep.subr.bf16.mxu1 %v1854_v59 }
  0xd7   : > { %1637 = vmatpush3.bf16.msra.mxu0 %v1857_v62 }
  0xd8   : > { %1665 = vmatpush3.bf16.msra.mxu1 %v1858_v63  ;;  %1638 = vmatprep.subr.bf16.mxu0 %v1859_v0  ;;  %v1554_v0 = vld [vmem:[%s2426_s4] ss:$0 sm:$0xff] }
  0xd9   : > { %1666 = vmatprep.subr.bf16.mxu1 %v1860_v1 }
  0xdb   : > { %1639 = vmatpush3.bf16.msra.mxu0 %v1861_v2 }
  0xdc   : > { %1667 = vmatpush3.bf16.msra.mxu1 %v1862_v3  ;;  %1640 = vmatprep.subr.bf16.mxu0 %v1863_v4 }
  0xdd   : > { %1668 = vmatprep.subr.bf16.mxu1 %v1864_v5 }
  0xdf   : > { %1641 = vmatpush3.bf16.msra.mxu0 %v1865_v6 }
  0xe0   : > { %1669 = vmatpush3.bf16.msra.mxu1 %v1866_v7  ;;  %1692 = vmatprep.subr.bf16.mxu0 %v1879_v16 }
  0xe2   : > { %1127 = vmatmul.mubr.bf16.vlgmr.msra.gmra.mrb[8].mxu0 %v1867_v8 }
  0xe3   : > { %1176 = vmatmul.mubr.bf16.vlgmr.msra.gmra.mrb[8].mxu1 %v1870_v10  ;;  %1134 = vmatprep.mubr.bf16.mxu0 %v1873_v12 }
  0xe4   : > { %1183 = vmatprep.mubr.bf16.mxu1 %v1875_v13  ;;  %1693 = vmatpush3.bf16.msra.mxu0 %v1879_v16 }
  0xe5   : > { %1694 = vmatprep.subr.bf16.mxu0 %v1880_v17 }
  0xe8   : > { %1695 = vmatpush3.bf16.msra.mxu0 %v1880_v17 }
  0xe9   : > { %1696 = vmatprep.subr.bf16.mxu0 %v1881_v18 }
  0xea   : > { %1135 = vmatmul.mubr.bf16.gmra.mrb[12].mxu0 %v1877_v14 }
  0xeb   : > { %1184 = vmatmul.mubr.bf16.gmra.mrb[12].mxu1 %v1878_v15 }
  0xec   : > { %1697 = vmatpush3.bf16.msra.mxu0 %v1881_v18 }
  0xed   : > { %1698 = vmatprep.subr.bf16.mxu0 %v1882_v19 }
  0xf0   : > { %1699 = vmatpush3.bf16.msra.mxu0 %v1882_v19 }
  0xf1   : > { %1700 = vmatprep.subr.bf16.mxu0 %v1883_v20 }
  0xf4   : > { %1701 = vmatpush3.bf16.msra.mxu0 %v1883_v20 }
  0xf5   : > { %1702 = vmatprep.subr.bf16.mxu0 %v1884_v21 }
  0xf8   : > { %1703 = vmatpush3.bf16.msra.mxu0 %v1884_v21 }
  0xf9   : > { %1704 = vmatprep.subr.bf16.mxu0 %v1885_v22 }
  0xfc   : > { %1705 = vmatpush3.bf16.msra.mxu0 %v1885_v22 }
  0xfd   : > { %1706 = vmatprep.subr.bf16.mxu0 %v1886_v23 }
 0x100   : > { %1707 = vmatpush3.bf16.msra.mxu0 %v1886_v23 }
 0x195   : > { %v1586_v24 = vpop.f32.mrb[0].mxu0 }
 0x196   : > { %v1614_v25 = vpop.f32.mrb[0].mxu1  ;;  %v1587_v26 = vpop.f32.mrb[1].mxu0 }
 0x197   : > { %v1588_v27 = vadd.f32 %v1587_v26, %v1586_v24  ;;  %v1615_v28 = vpop.f32.mrb[1].mxu1  ;;  %v1589_v29 = vpop.f32.mrb[2].mxu0 }
 0x198   : > { %v1616_v30 = vadd.f32 %v1615_v28, %v1614_v25  ;;  %v1617_v31 = vpop.f32.mrb[2].mxu1  ;;  %v1590_v32 = vpop.f32.mrb[3].mxu0 }
 0x199   : > { %v1591_v33 = vadd.f32 %v1590_v32, %v1589_v29  ;;  %v1618_v34 = vpop.f32.mrb[3].mxu1 }
 0x19a   : > { %v848_v35 = vadd.f32 %v1616_v30, %v1588_v27  ;;  %v1619_v36 = vadd.f32 %v1618_v34, %v1617_v31  ;;  %v1555_v31 = vld [vmem:[%s2428_s6] ss:$0 sm:$0xff] }
 0x19c   : > { %v851_v37 = vadd.f32 %v1619_v36, %v1591_v33 }
 0x19d   : > { %v1592_v38 = vpop.f32.mrb[4].mxu0 }
 0x19e   : > { %v1620_v39 = vpop.f32.mrb[4].mxu1  ;;  %v1593_v40 = vpop.f32.mrb[5].mxu0 }
 0x19f   : > { %v1594_v41 = vadd.f32 %v1593_v40, %v1592_v38  ;;  %v1621_v42 = vpop.f32.mrb[5].mxu1  ;;  %v1595_v43 = vpop.f32.mrb[6].mxu0 }
 0x1a0   : > { %v1622_v44 = vadd.f32 %v1621_v42, %v1620_v39  ;;  %v1623_v45 = vpop.f32.mrb[6].mxu1  ;;  %v1596_v46 = vpop.f32.mrb[7].mxu0 }
 0x1a1   : > { %v1597_v47 = vadd.f32 %v1596_v46, %v1595_v43  ;;  %v1624_v48 = vpop.f32.mrb[7].mxu1 }
 0x1a2   : > { %v856_v49 = vadd.f32 %v1622_v44, %v1594_v41  ;;  %v1625_v50 = vadd.f32 %v1624_v48, %v1623_v45 }
 0x1a4   : > { %v859_v51 = vadd.f32 %v1625_v50, %v1597_v47 }
 0x1b5   : > { %v1642_v52 = vpop.f32.mrb[8].mxu0 }
 0x1b6   : > { %v1670_v53 = vpop.f32.mrb[8].mxu1  ;;  %v1643_v54 = vpop.f32.mrb[9].mxu0 }
 0x1b7   : > { %v1644_v55 = vadd.f32 %v1643_v54, %v1642_v52  ;;  %v1671_v56 = vpop.f32.mrb[9].mxu1  ;;  %v1645_v57 = vpop.f32.mrb[10].mxu0 }
 0x1b8   : > { %v1672_v58 = vadd.f32 %v1671_v56, %v1670_v53  ;;  %v1673_v59 = vpop.f32.mrb[10].mxu1  ;;  %v1646_v60 = vpop.f32.mrb[11].mxu0 }
 0x1b9   : > { %v1129_v61 = vadd.f32 %v1644_v55, %v848_v35  ;;  %v1647_v62 = vadd.f32 %v1646_v60, %v1645_v57  ;;  %v1674_v63 = vpop.f32.mrb[11].mxu1 }
 0x1ba   : > { %v1675_v1 = vadd.f32 %v1674_v63, %v1673_v59 }
 0x1bb   : > { %v1178_v2 = vadd.f32 %v1672_v58, %v1129_v61  ;;  %v1132_v3 = vadd.f32 %v1647_v62, %v851_v37 }
 0x1bd   : > { %v1199_v4 = vadd.f32 %v1554_v0, %v1178_v2  ;;  %v1181_v5 = vadd.f32 %v1675_v1, %v1132_v3  ;;  %v1648_v6 = vpop.f32.mrb[12].mxu0 }
 0x1be   : > { %v1676_v7 = vpop.f32.mrb[12].mxu1  ;;  %v1649_v8 = vpop.f32.mrb[13].mxu0 }
 0x1bf   : > { %v1200_v9 = vadd.f32 %v1554_v0, %v1181_v5  ;;  %v1650_v10 = vadd.f32 %v1649_v8, %v1648_v6  ;;  %v1677_v11 = vpop.f32.mrb[13].mxu1  ;;  %v1651_v12 = vpop.f32.mrb[14].mxu0  ;;  %v1203_v16 = vmax.f32 %v1199_v4, 0.0 }
 0x1c0   : > { %v1678_v13 = vadd.f32 %v1677_v11, %v1676_v7  ;;  %v1679_v14 = vpop.f32.mrb[14].mxu1  ;;  %v1652_v15 = vpop.f32.mrb[15].mxu0 }
 0x1c1   : > { %v1204_v17 = vmax.f32 %v1200_v9, 0.0  ;;  %v1137_v18 = vadd.f32 %v1650_v10, %v856_v49  ;;  %v1653_v19 = vadd.f32 %v1652_v15, %v1651_v12  ;;  %v1680_v20 = vpop.f32.mrb[15].mxu1 }
 0x1c2   : > { %v1681_v21 = vadd.f32 %v1680_v20, %v1679_v14 }
 0x1c3   : > { %v1186_v22 = vadd.f32 %v1678_v13, %v1137_v18  ;;  %v1140_v23 = vadd.f32 %v1653_v19, %v859_v51  ;;  %v1207_v24 = vpack.c.bf16 %v1204_v17, %v1203_v16 }
 0x1c5   : > { %v1201_v25 = vadd.f32 %v1554_v0, %v1186_v22  ;;  %v1189_v26 = vadd.f32 %v1681_v21, %v1140_v23  ;;  %1708 = vmatprep.mubr.bf16.mxu0 %v1207_v24 }
 0x1c7   : > { %v1202_v27 = vadd.f32 %v1554_v0, %v1189_v26  ;;  %v1205_v28 = vmax.f32 %v1201_v25, 0.0 }
 0x1c9   : > { %v1206_v29 = vmax.f32 %v1202_v27, 0.0 }
 0x1cb   : > { %v1208_v30 = vpack.c.bf16 %v1206_v29, %v1205_v28 }
 0x1cd   : > { %1709 = vmatmul.mubr.bf16.vlgmr.msra.gmra.mrb[16].mxu0 %v1208_v30 }
 0x2a0   : > { %v1710_v32 = vpop.f32.mrb[16].mxu0 }
 0x2a1   : > { %v1314_v33 = vpop.f32.mrb[17].mxu0  ;;  %v1323_v38 = vadd.f32 %v1710_v32, %v1555_v31 }
 0x2a2   : > { %v1315_v34 = vadd.f32 %v1555_v31, %v1314_v33  ;;  %v1711_v35 = vpop.f32.mrb[18].mxu0 }
 0x2a3   : > { %v1317_v36 = vpop.f32.mrb[19].mxu0  ;;  %v1326_v39 = vadd.f32 %v1711_v35, %v1555_v31  ;;  %1331 = vst [vmem:[%s385_s27 + $0x10] sm:$0xff] %v1323_v38 }
 0x2a4   : > { %1329 = vst [vmem:[%s385_s27] sm:$0xff] %v1315_v34  ;;  %v1318_v37 = vadd.f32 %v1555_v31, %v1317_v36 }
 0x2a5   : > { %1332 = vst [vmem:[%s385_s27 + $0x18] sm:$0xff] %v1326_v39 }
 0x2a6   : > { %1330 = vst [vmem:[%s385_s27 + $0x8] sm:$0xff] %v1318_v37 }
 0x2a7 PF: > { %p21_p3 = scmp.ge.s32.totalorder %s2258_s20, 4   ;;  %s2446_s24 = smov %s2069_s25 }
 0x2a8   : > { %s2447_s25 = smov %s2073_s26  ;;  %s2448_s26 = smov %s2268_s11 }
 0x2a9   : > { %s2449_s27 = smov %s2258_s20  ;;  %23 = sbr.rel (!%p21_p3) target bundleno = 8 (0x8), region = 113 }
 0x2b0   :  { %1355 = vsyncpa [#allocation3], 1 }
 0x2b1   :  { %1357 = vsyncpa [#allocation3 + $0x1], 1 }
 0x2b2   :  { %1358 = vsyncpa [#allocation5], 1 }
 0x2b3   :  { %1360 = vsyncpa [#allocation5 + $0x1], 1 }
 0x2b4   :  { %1361 = vsyncpa [#allocation8], 1 }

</bundles_post_ra>
